<compile_context>
chip_gen: v7x
topology: tpu7x:2x2x1
jax: 0.10.0
libtpu: 0.0.40
codegen_flags: <defaults>
</compile_context>

<pallas_src>
import math

import numpy as np

import jax
import jax.numpy as jnp
from jax import lax
from jax.experimental import pallas as pl
from jax.experimental.pallas import tpu as pltpu


def _make_upscale_kernel(precision):
    def kernel(e_ref, x_ref, o_ref):
        # (Mt, g*W) @ (g*W, g*f*f*W) -> full lane-dense output slab in one dot.
        y = jnp.dot(
            x_ref[...],
            e_ref[...],
            preferred_element_type=jnp.float32,
            precision=precision,
        )
        o_ref[...] = y.astype(o_ref.dtype)

    return kernel


def _build_replication_matrix(W, factor, g, gain, dtype):
    """Fused row+column replication matrix, block-diagonal over g grouped rows.

    E[j, r*W*f + j'] = gain  iff  j'//f == j   (for r in [0, f))
    and the g-row grouping is E_big = kron(I_g, E_row).
    """
    f = factor
    jin = np.arange(W)[:, None]
    jout = np.arange(W * f)[None, :]
    e_col = ((jout // f) == jin).astype(np.float32) * float(gain)  # (W, W*f)
    e_row = np.tile(e_col, (1, f))                                 # (W, f*W*f)
    if g > 1:
        e_row = np.kron(np.eye(g, dtype=np.float32), e_row)        # (g*W, g*f*W*f)
    return jnp.asarray(e_row, dtype=dtype)


def _choose_row_group(M, W, factor, itemsize, max_e_bytes=4 * 1024 * 1024):
    """Group g adjacent flat input rows per flat output row so the stored
    last dim (g*f*f*W) is a multiple of 128 -> unmasked, lane-dense stores."""
    ow = factor * factor * W
    if ow % 128 == 0:
        return 1
    g = 128 // math.gcd(ow, 128)
    e_bytes = (g * W) * (g * ow) * itemsize
    if M % g == 0 and e_bytes <= max_e_bytes:
        return g
    return 1  # fall back to masked stores; still correct


def _choose_row_tile(M, row_in, row_out, itemsize, sublane, budget_bytes):
    """Flat rows per grid step, sized against an explicit VMEM budget.

    Accounts for double-buffered input and output tiles plus the f32 matmul
    intermediate; caps the tile so the grid has >= ~8 steps (pipelining and
    both v7x TensorCores), and aligns to the dtype's packed-sublane count.
    """
    per_row = 2 * row_in * itemsize + 2 * row_out * itemsize + row_out * 4
    mt = max(1, budget_bytes // per_row)
    mt = min(mt, max(sublane, pl.cdiv(M, 8)))  # keep a minimum grid depth
    if mt >= M:
        return M
    mt = max(sublane, (mt // sublane) * sublane)
    return min(mt, M)


def upscale2d(x, factor: int = 2, gain: float = 1):
    """Pallas TPU equivalent of Upscale2d.upscale2d (NCHW input)."""
    assert x.ndim == 4
    assert isinstance(factor, int) and factor >= 1

    if factor == 1:
        return x * jnp.asarray(gain, dtype=x.dtype) if gain != 1 else x

    N, C, H, W = x.shape
    f = factor

    if not jnp.issubdtype(x.dtype, jnp.floating):
        # TODO(synk): integer dtypes need a non-MXU replication path (v7x MXU
        # has no integer mode); use the plain-JAX formulation for them.
        y = x * jnp.asarray(gain, dtype=x.dtype) if gain != 1 else x
        y = jnp.broadcast_to(y[:, :, :, None, :, None], (N, C, H, f, W, f))
        return y.reshape(N, C, H * f, W * f)

    M = N * C * H                       # flattened (image, channel, row) axis
    itemsize = jnp.dtype(x.dtype).itemsize

    g = _choose_row_group(M, W, f, itemsize)
    Mg = M // g
    row_in = g * W                      # input elements per flat row
    row_out = g * f * f * W             # contiguous output elements per flat row

    e = _build_replication_matrix(W, f, g, gain, x.dtype)
    e_bytes = int(e.size) * itemsize

    sublane = {1: 32, 2: 16}.get(itemsize, 8)     # packed-sublane alignment
    budget = max(2 * 1024 * 1024, 20 * 1024 * 1024 - e_bytes)
    Mt = _choose_row_tile(Mg, row_in, row_out, itemsize, sublane, budget)

    xf = x.reshape(Mg, row_in)          # free, row-major contiguous

    grid = (pl.cdiv(Mg, Mt),)
    cost = pl.CostEstimate(
        flops=int(2 * Mg * row_in * row_out),
        transcendentals=0,
        bytes_accessed=int(M * W * itemsize * (1 + f * f) + e_bytes),
    )

    def _run(precision):
        return pl.pallas_call(
            _make_upscale_kernel(precision),
            out_shape=jax.ShapeDtypeStruct((Mg, row_out), x.dtype),
            grid_spec=pltpu.PrefetchScalarGridSpec(
                num_scalar_prefetch=0,
                grid=grid,
                in_specs=[
                    # Constant block index -> DMA'd once, reused every step.
                    pl.BlockSpec((row_in, row_out), lambda r: (0, 0)),
                    pl.BlockSpec((Mt, row_in), lambda r: (r, 0)),
                ],
                out_specs=pl.BlockSpec((Mt, row_out), lambda r: (r, 0)),
            ),
            compiler_params=pltpu.CompilerParams(
                dimension_semantics=("parallel",),
                vmem_limit_bytes=40 * 1024 * 1024,  # fits v7x 64 MiB physical
            ),
            cost_estimate=cost,
        )(e, xf)

    # HIGHEST precision keeps the f32 nearest-neighbor copy exact (the dot is
    # a single gain*x product per output element). Fall back to default
    # precision if this Mosaic build rejects the precision attribute.
    want_highest = x.dtype == jnp.float32
    try:
        out_flat = _run(lax.Precision.HIGHEST if want_highest else None)
    except Exception:  # pragma: no cover - older Mosaic w/o contract precision
        out_flat = _run(None)

    # Free reshape back to NCHW: (M/g, g*f*f*W) -> (N, C, H*f, W*f).
    return out_flat.reshape(N, C, H * f, W * f)


def _reference_upscale2d(x, factor=2, gain=1):
    # Pure-JAX reference mirroring the PyTorch view/expand/view semantics.
    if gain != 1:
        x = x * gain
    if factor != 1:
        N, C, H, W = x.shape
        x = jnp.broadcast_to(x[:, :, :, None, :, None],
                             (N, C, H, factor, W, factor))
        x = x.reshape(N, C, H * factor, W * factor)
    return x


if __name__ == "__main__":
    key = jax.random.PRNGKey(0)
    x = jax.random.normal(key, (2, 4, 16, 16), dtype=jnp.float32)

    factor, gain = 2, 1  # module defaults: Upscale2d(factor=2, gain=1)
    y = jax.block_until_ready(upscale2d(x, factor=factor, gain=gain))

    y_ref = _reference_upscale2d(x, factor=factor, gain=gain)
    assert y.shape == (2, 4, 32, 32)
    assert y.dtype == x.dtype
    assert jnp.allclose(y, y_ref, atol=1e-6, rtol=1e-6)

    print("KERNEL_OK")
</pallas_src>

<mosaic_0001>
module attributes {stable_mosaic.version = 11 : i64} {
  func.func @kernel(%arg0: i32, %arg1: memref<32x128xf32, #tpu.memory_space<vmem>>, %arg2: memref<8x32xf32, #tpu.memory_space<vmem>>, %arg3: memref<8x128xf32, #tpu.memory_space<vmem>>) attributes {dimension_semantics = [#tpu.dimension_semantics<parallel>], iteration_bounds = array<i64: 8>, scalar_prefetch = 0 : i64, scratch_operands = 0 : i64, tpu.core_type = #tpu.core_type<tc>, window_params = [{pipeline_mode = #tpu.pipeline_mode<synchronous>, transform_indices = @transform_0, window_bounds = array<i64: 32, 128>}, {transform_indices = @transform_1, window_bounds = array<i64: 8, 32>}, {transform_indices = @transform_2, window_bounds = array<i64: 8, 128>}]} {
    %c0 = arith.constant 0 : index
    %c0_0 = arith.constant 0 : index
    %0 = vector.load %arg2[%c0, %c0_0] : memref<8x32xf32, #tpu.memory_space<vmem>>, vector<8x32xf32>
    %c0_1 = arith.constant 0 : index
    %c0_2 = arith.constant 0 : index
    %1 = vector.load %arg1[%c0_1, %c0_2] : memref<32x128xf32, #tpu.memory_space<vmem>>, vector<32x128xf32>
    %cst = arith.constant dense<0.000000e+00> : vector<8x128xf32>
    %2 = tpu.matmul %0, %1, %cst {dimension_numbers = #tpu.dot_dimension_numbers<[1], [0], [0], [1], [0, 0, 1, 1], [], []>, precision = #tpu.contract_precision<fp32>} : vector<8x32xf32>, vector<32x128xf32>, vector<8x128xf32> -> vector<8x128xf32>
    %c0_3 = arith.constant 0 : index
    %c0_4 = arith.constant 0 : index
    %3 = vector.load %arg3[%c0_3, %c0_4] : memref<8x128xf32, #tpu.memory_space<vmem>>, vector<8x128xf32>
    tpu.vector_store %arg3[%c0_3, %c0_4], %2 {strides = array<i32>} : memref<8x128xf32, #tpu.memory_space<vmem>>, vector<8x128xf32>,
    return
  }
  func.func @transform_0(%arg0: i32) -> (i32, i32) {
    %c0_i32 = arith.constant 0 : i32
    %c0_i32_0 = arith.constant 0 : i32
    %c0_i32_1 = arith.constant 0 : i32
    return %c0_i32, %c0_i32_0 : i32, i32
  }
  func.func @transform_1(%arg0: i32) -> (i32, i32) {
    %c0_i32 = arith.constant 0 : i32
    %c0_i32_0 = arith.constant 0 : i32
    return %arg0, %c0_i32 : i32, i32
  }
  func.func @transform_2(%arg0: i32) -> (i32, i32) {
    %c0_i32 = arith.constant 0 : i32
    %c0_i32_0 = arith.constant 0 : i32
    return %arg0, %c0_i32 : i32, i32
  }
}

module attributes {stable_mosaic.version = 11 : i64} {
  func.func @kernel(%arg0: i32, %arg1: memref<32x128xf32, #tpu.memory_space<vmem>>, %arg2: memref<8x32xf32, #tpu.memory_space<vmem>>, %arg3: memref<8x128xf32, #tpu.memory_space<vmem>>) attributes {dimension_semantics = [#tpu.dimension_semantics<parallel>], iteration_bounds = array<i64: 8>, scalar_prefetch = 0 : i64, scratch_operands = 0 : i64, tpu.core_type = #tpu.core_type<tc>, window_params = [{pipeline_mode = #tpu.pipeline_mode<synchronous>, transform_indices = @transform_0, window_bounds = array<i64: 32, 128>}, {transform_indices = @transform_1, window_bounds = array<i64: 8, 32>}, {transform_indices = @transform_2, window_bounds = array<i64: 8, 128>}]} {
    %c0 = arith.constant 0 : index
    %c0_0 = arith.constant 0 : index
    %0 = vector.load %arg2[%c0, %c0_0] : memref<8x32xf32, #tpu.memory_space<vmem>>, vector<8x32xf32>
    %c0_1 = arith.constant 0 : index
    %c0_2 = arith.constant 0 : index
    %1 = vector.load %arg1[%c0_1, %c0_2] : memref<32x128xf32, #tpu.memory_space<vmem>>, vector<32x128xf32>
    %cst = arith.constant dense<0.000000e+00> : vector<8x128xf32>
    %2 = tpu.matmul %0, %1, %cst {dimension_numbers = #tpu.dot_dimension_numbers<[1], [0], [0], [1], [0, 0, 1, 1], [], []>} : vector<8x32xf32>, vector<32x128xf32>, vector<8x128xf32> -> vector<8x128xf32>
    %c0_3 = arith.constant 0 : index
    %c0_4 = arith.constant 0 : index
    %3 = vector.load %arg3[%c0_3, %c0_4] : memref<8x128xf32, #tpu.memory_space<vmem>>, vector<8x128xf32>
    tpu.vector_store %arg3[%c0_3, %c0_4], %2 {strides = array<i32>} : memref<8x128xf32, #tpu.memory_space<vmem>>, vector<8x128xf32>,
    return
  }
  func.func @transform_0(%arg0: i32) -> (i32, i32) {
    %c0_i32 = arith.constant 0 : i32
    %c0_i32_0 = arith.constant 0 : i32
    %c0_i32_1 = arith.constant 0 : i32
    return %c0_i32, %c0_i32_0 : i32, i32
  }
  func.func @transform_1(%arg0: i32) -> (i32, i32) {
    %c0_i32 = arith.constant 0 : i32
    %c0_i32_0 = arith.constant 0 : i32
    return %arg0, %c0_i32 : i32, i32
  }
  func.func @transform_2(%arg0: i32) -> (i32, i32) {
    %c0_i32 = arith.constant 0 : i32
    %c0_i32_0 = arith.constant 0 : i32
    return %arg0, %c0_i32 : i32, i32
  }
}

</mosaic_0001>

<bundles_post_ra>
// kernel: tpu_custom_call.1
= control target key start
LH: loop header
LB: loop body
LE: loop exit
PB: predicated region body
PF: predicated region fallthrough
CT: control target
= control target key end

     0   :  { %7 = vsyncpa [#allocation3], 0  ;;  %s1119_s0 = inlined_call_operand.vmem [shape: f32[32,128], index: 0, kind: input, shape index: {}]   ;;  %s1120_s1 = inlined_call_operand.vmem [shape: f32[64,32], index: 1, kind: input, shape index: {}]   ;;  %s1121_s2 = inlined_call_operand.hbm [shape: f32[64,128], index: 2, kind: output, shape index: {}]  }
   0x1   :  { %9 = vsyncpa [#allocation3 + $0x1], 0  ;;  %s983_s9 = smov 0   ;;  %s985_s10 = smov 0  }
   0x2   :  { %s987_s11 = smov 0   ;;  %s989_s12 = smov 0  }
   0x3 LB: > { %s1004_s13 = sadd.s32 4294967295, %s962_s12   ;;  %s707_s14 = sadd.s32 4294967294, %s962_s12   ;;  %s962_s12 = sphi %s989_s12, %s1127_s12   ;;  %s958_s11 = sphi %s987_s11, %s1126_s11   ;;  %s954_s10 = sphi %s985_s10, %s1125_s10   ;;  %s950_s9 = sphi %s983_s9, %s1124_s9  }
   0x4   : > { %s1008_s15 = sadd.s32 1, %s962_s12   ;;  %s69_s16 = sadd.s32 1, %s958_s11 }
   0x5   : > { %s66_s17 = ssub.s32 %s962_s12, %s1008_s15  ;;  %p79_p0 = scmp.ne.s32.totalorder %s958_s11, %s954_s10 }
   0x6   : > { %p67_p1 = scmp.eq.s32.totalorder %s66_s17, 0  ;;  %p80_p2 = scmp.eq.s32.totalorder %s1004_s13, 7 }
   0x7   : > { %p85_p3 = scmp.ne.s32.totalorder %s954_s10, %s950_s9  ;;  %p86_p4 = scmp.eq.s32.totalorder %s707_s14, 7 }
   0x8   : > { %s1019_s18 = scalar_select %p67_p1, %s958_s11, %s69_s16  }
   0x9   : > { %p1021_p5 = por %p80_p2, %p79_p0  ;;  %p1025_p6 = por %p86_p4, %p85_p3 }
   0xa   : > { %p710_p7 = scmp.ge.s32.totalorder %s962_s12, 1  ;;  %p114_p8 = scmp.lt.s32.totalorder %s962_s12, 9 }
   0xc   : > { %p115_p9 = pnand %p710_p7, %p114_p8 }
   0xd   : > { %v140_v0 = vld [vmem:[%s1119_s0] sm:$0xff] (!%p115_p9)  ;;  %v141_v1 = vld [vmem:[%s1119_s0 + $0x8] sm:$0xff] (!%p115_p9)  ;;  %v142_v2 = vld [vmem:[%s1119_s0 + $0x10] sm:$0xff] (!%p115_p9)  ;;  %v964_v3 = vmov (!%p115_p9), 0.0|0.0   ;;  %p135_p10 = scmp.lt.s32.totalorder (!%p115_p9), %s1004_s13, 7  ;;  %vm965_vm0 = vmmov (!%p115_p9), 0  }
   0xe   : > { %118 = sbr.rel (%p115_p9) target bundleno = 281 (0x119), region = 28  ;;  %831 = vmatprep.subr.bf16.mxu0 (!%p115_p9), %v964_v3  ;;  %v149_v4 = vand.u32 (!%p115_p9), 4294901760, %v140_v0  ;;  %v152_v5 = vand.u32 (!%p115_p9), 4294901760, %v141_v1  ;;  %813 = vmatprep.subr.bf16.mxu1 (!%p115_p9), %v964_v3  ;;  %v143_v6 = vld [vmem:[%s1119_s0 + $0x18] sm:$0xff] (!%p115_p9)  ;;  %v155_v7 = vand.u32 (!%p115_p9), 4294901760, %v142_v2  ;;  %v966_v9 = vmov (!%p115_p9), 0.0  }
   0xf   : > { %v158_v8 = vand.u32 (!%p115_p9), 4294901760, %v143_v6  ;;  %788 = vmatprep.mubr.msk.f32.mxu0 (!%p115_p9), %vm965_vm0, %v966_v9  ;;  %755 = vmatprep.mubr.msk.f32.mxu1 (!%p115_p9), %vm965_vm0, %v966_v9  ;;  %vm144_vm1 = vcmask (!%p115_p9), 261120   ;;  %s132_s6 = sand.u32 (!%p115_p9), 1, %s954_s10   ;;  %s714_s8 = sshll.u32 (!%p115_p9), %s1004_s13, 7 }
  0x10   : > { %v814_v10 = vpack.c.bf16 (!%p115_p9), %v152_v5, %v149_v4  ;;  %v229_v11 = vsub.f32 (!%p115_p9), %v140_v0, %v149_v4  ;;  %v236_v12 = vsub.f32 (!%p115_p9), %v141_v1, %v152_v5  ;;  %v243_v13 = vsub.f32 (!%p115_p9), %v142_v2, %v155_v7  ;;  %s711_s7 = sshll.u32 (!%p115_p9), %s132_s6, 3  ;;  %s1077_s22 = scalar_lea.hbm (!%p115_p9), %s1121_s2, %s714_s8 }
  0x11   : > { %v250_v14 = vsub.f32 (!%p115_p9), %v143_v6, %v158_v8  ;;  %v817_v15 = vpack.c.bf16 (!%p115_p9), %v158_v8, %v155_v7  ;;  %s134_s14 = scalar_lea.vmem (!%p115_p9), [#allocation2], %s711_s7  ;;  %s635_s23 = scalar_lea.sflag (!%p115_p9), [#allocation3], %s132_s6 }
  0x12   : > { %833 = vmatpush3.bf16.msra.mxu0 (!%p115_p9), %v814_v10  ;;  %815 = vmatpush3.bf16.msra.mxu1 (!%p115_p9), %v814_v10  ;;  %v230_v16 = vand.u32 (!%p115_p9), 4294901760, %v229_v11  ;;  %v237_v17 = vand.u32 (!%p115_p9), 4294901760, %v236_v12  ;;  %v244_v19 = vand.u32 (!%p115_p9), 4294901760, %v243_v13  ;;  %v826_v39 = vpack.c.bf16 (!%p115_p9), %v236_v12, %v229_v11  ;;  %s648_s16 = sshll.u32 (!%p115_p9), %s134_s14, 4  ;;  %s1079_s16 = int_to_ptr.vmem [resolvable:$true] %s648_s16 }
  0x13   : > { %834 = vmatprep.subr.bf16.mxu0 (!%p115_p9), %v964_v3  ;;  %816 = vmatprep.subr.bf16.mxu1 (!%p115_p9), %v964_v3  ;;  %v251_v23 = vand.u32 (!%p115_p9), 4294901760, %v250_v14  ;;  %v829_v40 = vpack.c.bf16 (!%p115_p9), %v250_v14, %v243_v13  ;;  %s900_s24 = scalar_lea.vmem (!%p115_p9), %s1079_s16, 128 }
  0x14   : > { %v231_v21 = vsub.f32 (!%p115_p9), %v229_v11, %v230_v16  ;;  %v238_v22 = vsub.f32 (!%p115_p9), %v236_v12, %v237_v17  ;;  %v838_v26 = vpack.c.bf16 (!%p115_p9), %v237_v17, %v230_v16  ;;  %v245_v29 = vsub.f32 (!%p115_p9), %v243_v13, %v244_v19  ;;  %p901_p11 = scmp.ne.s32.totalorder (!%p115_p9), %s1079_s16, %s900_s24 }
  0x15   : > { %s136_s29 = scalar_select %p135_p10, %s1004_s13, 7  ;;  %v252_v30 = vsub.f32 %v250_v14, %v251_v23  ;;  %v841_v34 = vpack.c.bf16 %v251_v23, %v244_v19 }
  0x16   : > { %836 = vmatpush3.bf16.msra.mxu0 %v817_v15  ;;  %818 = vmatpush3.bf16.msra.mxu1 %v817_v15  ;;  %v232_v27 = vand.u32 4294901760, %v231_v21  ;;  %v239_v28 = vand.u32 4294901760, %v238_v22  ;;  %v246_v35 = vand.u32 4294901760, %v245_v29  ;;  %p902_p12 = pnand %p901_p11, %p1021_p5  ;;  %s967_s13 = smov [#allocation2]  }
  0x17   : > { %s712_s30 = sshll.u32 %s136_s29, 3  ;;  %837 = vmatprep.subr.bf16.mxu0 %v964_v3  ;;  %819 = vmatprep.subr.bf16.mxu1 %v964_v3  ;;  %v253_v36 = vand.u32 4294901760, %v252_v30  ;;  %s904_s25 = sshll.u32 %s967_s13, 4  ;;  %s905_s25 = int_to_ptr.vmem [resolvable:$false] %s904_s25 }
  0x18   : > { %s138_s5 = scalar_lea.vmem %s1120_s1, %s712_s30  ;;  %v820_v33 = vpack.c.bf16 %v239_v28, %v232_v27  ;;  %p903_p13 = pneg %p902_p12 }
  0x19   : > { %v139_v18 = vld [vmem:[%s138_s5] sm:$0xff]  ;;  %v823_v38 = vpack.c.bf16 %v253_v36, %v246_v35  ;;  %s906_s26 = scalar_lea.vmem %s905_s25, 256  ;;  %p907_p0 = scmp.lt.s32.totalorder %s1079_s16, %s905_s25 }
  0x1a   : > { %v146_v20 = vsel %vm144_vm1, %v139_v18, 0  ;;  %p908_p1 = scmp.lt.s32.totalorder %s906_s26, %s900_s24 }
  0x1b   : > { %v217_v24 = vand.u32 4294901760, %v146_v20 }
  0x1c   : > { %p909_p2 = por %p908_p1, %p907_p0 }
  0x1d   : > { %v218_v25 = vsub.f32 %v146_v20, %v217_v24 }
  0x1e   : > { %p910_p3 = pnand %p909_p2, %p903_p13 }
  0x1f   : > { %v219_v31 = vand.u32 4294901760, %v218_v25 }
  0x21   : > { %789 = vmatmul.mubr.f32.vlgmr.msra.gmra.mrb[0].mxu0 %v219_v31  ;;  %v220_v32 = vsub.f32 %v218_v25, %v219_v31 }
  0x22   : > { %839 = vmatpush3.bf16.msra.mxu0 %v838_v26  ;;  %799 = vmatprep.mubr.msk.f32.mxu0 %vm965_vm0, %v966_v9 }
  0x23   : > { %v221_v37 = vand.u32 4294901760, %v220_v32  ;;  %840 = vmatprep.subr.bf16.mxu0 %v964_v3 }
  0x25   : > { %756 = vmatmul.mubr.f32.vlgmr.msra.gmra.mrb[0].mxu1 %v221_v37 }
  0x26   : > { %821 = vmatpush3.bf16.msra.mxu1 %v820_v33  ;;  %842 = vmatpush3.bf16.msra.mxu0 %v841_v34 }
  0x27   : > { %822 = vmatprep.subr.bf16.mxu1 %v964_v3  ;;  %843 = vmatprep.subr.bf16.mxu0 %v964_v3 }
  0x28   : > { %766 = vmatprep.mubr.msk.f32.mxu1 %vm965_vm0, %v966_v9 }
  0x29   : > { %800 = vmatmul.mubr.f32.vlgmr.msra.gmra.mrb[0].mxu0 %v217_v24 }
  0x2a   : > { %824 = vmatpush3.bf16.msra.mxu1 %v823_v38  ;;  %845 = vmatpush3.bf16.msra.mxu0 %v814_v10 }
  0x2b   : > { %825 = vmatprep.subr.bf16.mxu1 %v964_v3  ;;  %846 = vmatprep.subr.bf16.mxu0 %v964_v3 }
  0x2c   : > { %810 = vmatprep.mubr.msk.f32.mxu0 %vm965_vm0, %v966_v9 }
  0x2d   : > { %767 = vmatmul.mubr.f32.vlgmr.msra.gmra.mrb[0].mxu1 %v217_v24 }
  0x2e   : > { %827 = vmatpush3.bf16.msra.mxu1 %v826_v39  ;;  %848 = vmatpush3.bf16.msra.mxu0 %v817_v15 }
  0x2f   : > { %828 = vmatprep.subr.bf16.mxu1 %v964_v3  ;;  %777 = vmatprep.mubr.msk.f32.mxu1 %vm965_vm0, %v966_v9 }
  0x31   : > { %811 = vmatmul.mubr.f32.vlgmr.msra.gmra.mrb[0].mxu0 %v217_v24 }
  0x32   : > { %830 = vmatpush3.bf16.msra.mxu1 %v829_v40 }
  0x35   : > { %778 = vmatmul.mubr.f32.vlgmr.msra.gmra.mrb[0].mxu1 %v218_v25 }
 0x104   : > { %v629_v41 = vpop.f32.mrb[0].mxu0 }
 0x105   : > { %v812_v42 = vpop.f32.mrb[1].mxu0 }
 0x108   : > { %v394_v43 = vpop.f32.mrb[0].mxu1 }
 0x109   : > { %v849_v44 = vadd.f32 %v629_v41, %v394_v43  ;;  %v779_v45 = vpop.f32.mrb[1].mxu1 }
 0x10b   : > { %633 = vst [vmem:[%s134_s14] sm:$0xff] %v849_v44 }
 0x10c   : > { %913 = shalt.err (!%p910_p3)
}
 0x10d   : > { %s914_s27 = scalar_lea.hbm %s1077_s22, 128  ;;  %s918_s30 = scalar_lea.hbm %s1121_s2, 1024 }
 0x10e   : > { %p915_p4 = scmp.ne.s32.totalorder %s1077_s22, %s914_s27  ;;  %p919_p9 = scmp.lt.u32.totalorder %s1077_s22, %s1121_s2 }
 0x10f   : > { %p920_p10 = scmp.lt.u32.totalorder %s918_s30, %s914_s27  ;;  %p922_p12 = scmp.lt.u32.totalorder %s914_s27, %s1077_s22 }
 0x110   : > { %p916_p7 = pnand %p915_p4, %p1021_p5 }
 0x111   : > { %p921_p11 = por %p920_p10, %p919_p9 }
 0x112   : > { %p917_p8 = pneg %p916_p7 }
 0x113   : > { %p923_p13 = por %p922_p12, %p921_p11 }
 0x115   : > { %p924_p0 = pnand %p923_p13, %p917_p8 }
 0x117   : > { %927 = shalt.err (!%p924_p0)
}
 0x118   : > { %858 = dma.vmem_to_hbm [thread:$0]  (%p1021_p5), %s1079_s16, 128, %s1077_s22, %s635_s23  }
 0x119 PF: > { %p864_p1 = scmp.ge.s32.totalorder %s962_s12, 2  ;;  %s660_s5 = sand.u32 1, %s950_s9  }
 0x11a   : > { %s661_s6 = scalar_lea.sflag [#allocation3], %s660_s5 }
 0x11b   : > { %p861_p2 = pnand %p864_p1, %p1025_p6 }
 0x11d   : > { %945 = dma.done.wait (!%p861_p2), %s661_s6, 128  }
 0x11e   : > { %947 = vsyncadd (!%p861_p2), %s661_s6, 4294967168  ;;  %p12_p3 = scmp.ge.s32.totalorder %s1008_s15, 10   ;;  %s1124_s9 = smov %s954_s10 }
 0x11f   : > { %s1125_s10 = smov %s958_s11  ;;  %s1126_s11 = smov %s1019_s18 }
 0x120   : > { %s1127_s12 = smov %s1008_s15  ;;  %14 = sbr.rel (!%p12_p3) target bundleno = 3 (0x3), region = 63 }
 0x127   :  { %666 = vsyncpa [#allocation3], 1 }
 0x128   :  { %668 = vsyncpa [#allocation3 + $0x1], 1 }

// kernel: tpu_custom_call.1
= control target key start
LH: loop header
LB: loop body
LE: loop exit
PB: predicated region body
PF: predicated region fallthrough
CT: control target
= control target key end

     0   :  { %7 = vsyncpa [#allocation3], 0  ;;  %s562_s0 = inlined_call_operand.vmem [shape: f32[32,128], index: 0, kind: input, shape index: {}]   ;;  %s563_s1 = inlined_call_operand.vmem [shape: f32[64,32], index: 1, kind: input, shape index: {}]   ;;  %s564_s2 = inlined_call_operand.hbm [shape: f32[64,128], index: 2, kind: output, shape index: {}]  }
   0x1   :  { %9 = vsyncpa [#allocation3 + $0x1], 0  ;;  %s450_s9 = smov 0   ;;  %s452_s10 = smov 0  }
   0x2   :  { %s454_s11 = smov 0   ;;  %s456_s12 = smov 0  }
   0x3 LB: > { %s471_s13 = sadd.s32 4294967295, %s429_s12   ;;  %s292_s14 = sadd.s32 4294967294, %s429_s12   ;;  %s429_s12 = sphi %s456_s12, %s570_s12   ;;  %s425_s11 = sphi %s454_s11, %s569_s11   ;;  %s421_s10 = sphi %s452_s10, %s568_s10   ;;  %s417_s9 = sphi %s450_s9, %s567_s9  }
   0x4   : > { %s475_s15 = sadd.s32 1, %s429_s12   ;;  %s69_s16 = sadd.s32 1, %s425_s11 }
   0x5   : > { %s66_s17 = ssub.s32 %s429_s12, %s475_s15  ;;  %p79_p0 = scmp.ne.s32.totalorder %s425_s11, %s421_s10 }
   0x6   : > { %p67_p1 = scmp.eq.s32.totalorder %s66_s17, 0  ;;  %p80_p2 = scmp.eq.s32.totalorder %s471_s13, 7 }
   0x7   : > { %p85_p3 = scmp.ne.s32.totalorder %s421_s10, %s417_s9  ;;  %p86_p4 = scmp.eq.s32.totalorder %s292_s14, 7 }
   0x8   : > { %s486_s18 = scalar_select %p67_p1, %s425_s11, %s69_s16  }
   0x9   : > { %p488_p5 = por %p80_p2, %p79_p0  ;;  %p492_p6 = por %p86_p4, %p85_p3 }
   0xa   : > { %p295_p7 = scmp.ge.s32.totalorder %s429_s12, 1  ;;  %p114_p8 = scmp.lt.s32.totalorder %s429_s12, 9 }
   0xc   : > { %p115_p9 = pnand %p295_p7, %p114_p8 }
   0xd   : > { %v140_v0 = vld [vmem:[%s562_s0] sm:$0xff] (!%p115_p9)  ;;  %v141_v1 = vld [vmem:[%s562_s0 + $0x8] sm:$0xff] (!%p115_p9)  ;;  %v142_v2 = vld [vmem:[%s562_s0 + $0x10] sm:$0xff] (!%p115_p9)  ;;  %v431_v3 = vmov (!%p115_p9), 0.0|0.0   ;;  %vm432_vm0 = vmmov (!%p115_p9), 0   ;;  %v433_v6 = vmov (!%p115_p9), 0.0  }
   0xe   : > { %118 = sbr.rel (%p115_p9) target bundleno = 252 (0xfc), region = 28  ;;  %319 = vmatprep.subr.bf16.mxu0 (!%p115_p9), %v431_v3  ;;  %v320_v4 = vpack.c.bf16 (!%p115_p9), %v141_v1, %v140_v0  ;;  %v143_v5 = vld [vmem:[%s562_s0 + $0x18] sm:$0xff] (!%p115_p9)  ;;  %316 = vmatprep.mubr.msk.f32.mxu0 (!%p115_p9), %vm432_vm0, %v433_v6  ;;  %p135_p10 = scmp.lt.s32.totalorder (!%p115_p9), %s471_s13, 7  ;;  %vm144_vm1 = vcmask (!%p115_p9), 261120  }
   0xf   : > { %v323_v7 = vpack.c.bf16 (!%p115_p9), %v143_v5, %v142_v2  ;;  %s132_s6 = sand.u32 (!%p115_p9), 1, %s421_s10   ;;  %s300_s16 = sshll.u32 (!%p115_p9), %s471_s13, 7 }
  0x10   : > { %321 = vmatpush3.bf16.msra.mxu0 (!%p115_p9), %v320_v4  ;;  %s296_s7 = sshll.u32 (!%p115_p9), %s132_s6, 3  ;;  %s522_s22 = scalar_lea.hbm (!%p115_p9), %s564_s2, %s300_s16 }
  0x11   : > { %322 = vmatprep.subr.bf16.mxu0 (!%p115_p9), %v431_v3  ;;  %s134_s8 = scalar_lea.vmem (!%p115_p9), [#allocation2], %s296_s7  ;;  %s220_s23 = scalar_lea.sflag (!%p115_p9), [#allocation3], %s132_s6 }
  0x12   : > { %s233_s14 = sshll.u32 (!%p115_p9), %s134_s8, 4  ;;  %s517_s14 = int_to_ptr.vmem [resolvable:$true] %s233_s14 }
  0x13   : > { %s367_s24 = scalar_lea.vmem (!%p115_p9), %s517_s14, 128 }
  0x14   : > { %324 = vmatpush3.bf16.msra.mxu0 (!%p115_p9), %v323_v7  ;;  %p368_p11 = scmp.ne.s32.totalorder (!%p115_p9), %s517_s14, %s367_s24 }
  0x15   : > { %s136_s29 = scalar_select %p135_p10, %s471_s13, 7 }
  0x16   : > { %p369_p12 = pnand %p368_p11, %p488_p5  ;;  %s434_s13 = smov [#allocation2]  }
  0x17   : > { %s297_s30 = sshll.u32 %s136_s29, 3  ;;  %s371_s25 = sshll.u32 %s434_s13, 4  ;;  %s372_s25 = int_to_ptr.vmem [resolvable:$false] %s371_s25 }
  0x18   : > { %s138_s5 = scalar_lea.vmem %s563_s1, %s297_s30  ;;  %p370_p13 = pneg %p369_p12 }
  0x19   : > { %v139_v8 = vld [vmem:[%s138_s5] sm:$0xff]  ;;  %s373_s26 = scalar_lea.vmem %s372_s25, 256  ;;  %p374_p0 = scmp.lt.s32.totalorder %s517_s14, %s372_s25 }
  0x1a   : > { %317 = vmatmul.mubr.msk.f32.vlgmr.msra.gmra.mrb[0].mxu0 %vm144_vm1, %v139_v8  ;;  %p375_p1 = scmp.lt.s32.totalorder %s373_s26, %s367_s24 }
  0x1c   : > { %p376_p2 = por %p375_p1, %p374_p0 }
  0x1e   : > { %p377_p3 = pnand %p376_p2, %p370_p13 }
  0xed   : > { %v214_v9 = vpop.f32.mrb[0].mxu0 }
  0xee   : > { %218 = vst [vmem:[%s134_s8] sm:$0xff] %v214_v9  ;;  %v318_v10 = vpop.f32.mrb[1].mxu0 }
  0xef   : > { %380 = shalt.err (!%p377_p3)
}
  0xf0   : > { %s381_s27 = scalar_lea.hbm %s522_s22, 128  ;;  %s385_s30 = scalar_lea.hbm %s564_s2, 1024 }
  0xf1   : > { %p382_p4 = scmp.ne.s32.totalorder %s522_s22, %s381_s27  ;;  %p386_p9 = scmp.lt.u32.totalorder %s522_s22, %s564_s2 }
  0xf2   : > { %p387_p10 = scmp.lt.u32.totalorder %s385_s30, %s381_s27  ;;  %p389_p12 = scmp.lt.u32.totalorder %s381_s27, %s522_s22 }
  0xf3   : > { %p383_p7 = pnand %p382_p4, %p488_p5 }
  0xf4   : > { %p388_p11 = por %p387_p10, %p386_p9 }
  0xf5   : > { %p384_p8 = pneg %p383_p7 }
  0xf6   : > { %p390_p13 = por %p389_p12, %p388_p11 }
  0xf8   : > { %p391_p0 = pnand %p390_p13, %p384_p8 }
  0xfa   : > { %394 = shalt.err (!%p391_p0)
}
  0xfb   : > { %325 = dma.vmem_to_hbm [thread:$0]  (%p488_p5), %s517_s14, 128, %s522_s22, %s220_s23  }
  0xfc PF: > { %p331_p1 = scmp.ge.s32.totalorder %s429_s12, 2  ;;  %s245_s5 = sand.u32 1, %s417_s9  }
  0xfd   : > { %s246_s6 = scalar_lea.sflag [#allocation3], %s245_s5 }
  0xfe   : > { %p328_p2 = pnand %p331_p1, %p492_p6 }
 0x100   : > { %412 = dma.done.wait (!%p328_p2), %s246_s6, 128  }
 0x101   : > { %414 = vsyncadd (!%p328_p2), %s246_s6, 4294967168  ;;  %p12_p3 = scmp.ge.s32.totalorder %s475_s15, 10   ;;  %s567_s9 = smov %s421_s10 }
 0x102   : > { %s568_s10 = smov %s425_s11  ;;  %s569_s11 = smov %s486_s18 }
 0x103   : > { %s570_s12 = smov %s475_s15  ;;  %14 = sbr.rel (!%p12_p3) target bundleno = 3 (0x3), region = 63 }
 0x10a   :  { %251 = vsyncpa [#allocation3], 1 }
 0x10b   :  { %253 = vsyncpa [#allocation3 + $0x1], 1 }

</bundles_post_ra>
